<compile_context>
chip_gen: v7x
topology: tpu7x:2x2x1
jax: 0.10.0
libtpu: 0.0.40
codegen_flags: <defaults>
</compile_context>

<pallas_src>
import jax
import jax.numpy as jnp
import numpy as np
from jax.experimental import pallas as pl
from jax.experimental.pallas import tpu as pltpu

LANE = 128


def _round_up(x, m):
    return ((x + m - 1) // m) * m


def _vmem_limit_bytes():
    """Per-generation VMEM limit (~75% of capacity; 96 MiB v5e/v6e, 48 MiB v7x)."""
    try:
        cap = int(pltpu.get_tpu_info().vmem_capacity_bytes)
    except Exception:
        cap = 64 * 1024 * 1024
    return max(32 * 1024 * 1024, min(int(cap * 3 // 4), 112 * 1024 * 1024))


def _plan_agg(n_pad, tm, hp, gp, vmem_limit):
    """Pick the A k-tile size and whether XW can sit resident in VMEM."""
    fixed = (2 * tm * hp * 2      # h_out tile (bf16, double-buffered)
             + tm * hp * 4        # f32 accumulator scratch
             + 2 * gp * tm * 4    # P columns tile
             + 2 * gp * hp * 4    # pool partial tile
             + 2 * hp * 4)        # bias
    tk = 256
    for cand in (2048, 1024, 512, 256):
        if cand <= n_pad and n_pad % cand == 0:
            if fixed + 2 * tm * cand * 2 + 2 * cand * hp * 2 <= vmem_limit:
                tk = cand
                break
    a_bytes = 2 * tm * tk * 2
    xw_resident = (fixed + a_bytes + 2 * n_pad * hp * 2) <= vmem_limit
    return tk, xw_resident


# --------------------------- kernels ---------------------------

def xw_kernel(h_ref, w_ref, xw_ref):
    # Feature transform for one row tile: XW = h @ W (bf16 x bf16, f32 accumulate).
    xw_ref[...] = jnp.dot(h_ref[...], w_ref[...],
                          preferred_element_type=jnp.float32).astype(xw_ref.dtype)


def make_agg_kernel(tk, xw_resident):
    def agg_kernel(a_ref, xw_ref, b_ref, p_ref, h_ref, pool_ref, acc_ref):
        # acc[i] += A[i, k] @ XW[k]   (bf16 inputs, f32 accumulation on MXU)
        k = pl.program_id(1)

        @pl.when(k == 0)
        def _init():
            acc_ref[...] = jnp.zeros_like(acc_ref)

        if xw_resident:
            # XW is the full [n_pad, hp] array resident in VMEM (constant block index);
            # slice the current k-tile in place.
            start = pl.multiple_of(k * tk, tk)
            xw = xw_ref[pl.ds(start, tk), :]
        else:
            xw = xw_ref[...]

        acc_ref[...] += jnp.dot(a_ref[...], xw, preferred_element_type=jnp.float32)

        @pl.when(k == pl.num_programs(1) - 1)
        def _finalize():
            # Bias + ReLU on the f32 accumulator, store bf16 node features.
            h = jnp.maximum(acc_ref[...] + b_ref[...], 0.0)
            h_ref[...] = h.astype(h_ref.dtype)
            # Partial sum-pool for this row tile: P[:, i_tile] @ h_tile  ([Gp, Hp]).
            pool_ref[...] = jnp.dot(p_ref[...], h,
                                    preferred_element_type=jnp.float32)[None]

    return agg_kernel


# --------------------------- per-layer wrapper ---------------------------

def gcn_layer(a_hat, pool_mat, h_in, w_bf, b_pad, *, tm, tk, xw_resident, vmem_limit):
    """One GCNConv+ReLU layer plus its sum-pool, all in Pallas."""
    n_pad = a_hat.shape[0]
    fin = h_in.shape[1]
    hp = w_bf.shape[1]
    gp = pool_mat.shape[0]
    n_i = n_pad // tm
    n_k = n_pad // tk

    # 1) feature transform  XW = h_in @ W  (tiled over rows, bf16 output)
    xw = pl.pallas_call(
        xw_kernel,
        out_shape=jax.ShapeDtypeStruct((n_pad, hp), jnp.bfloat16),
        grid=(n_i,),
        in_specs=[pl.BlockSpec((tm, fin), lambda i: (i, 0)),
                  pl.BlockSpec((fin, hp), lambda i: (0, 0))],
        out_specs=pl.BlockSpec((tm, hp), lambda i: (i, 0)),
        compiler_params=pltpu.CompilerParams(
            dimension_semantics=("parallel",),
            vmem_limit_bytes=vmem_limit),
    )(h_in, w_bf)

    # XW: VMEM-resident full array (DMA once) when it fits, else streamed per k-tile.
    if xw_resident:
        xw_spec = pl.BlockSpec((n_pad, hp), lambda i, k: (0, 0))
    else:
        xw_spec = pl.BlockSpec((tk, hp), lambda i, k: (k, 0))

    # 2) aggregation  h = relu(A_hat @ XW + b), plus per-row-tile pool partials
    h_out, pool_part = pl.pallas_call(
        make_agg_kernel(tk, xw_resident),
        out_shape=(jax.ShapeDtypeStruct((n_pad, hp), jnp.bfloat16),
                   jax.ShapeDtypeStruct((n_i, gp, hp), jnp.float32)),
        grid=(n_i, n_k),
        in_specs=[pl.BlockSpec((tm, tk), lambda i, k: (i, k)),   # A_hat tile (bf16)
                  xw_spec,                                       # XW (bf16)
                  pl.BlockSpec((1, hp), lambda i, k: (0, 0)),    # bias (resident, f32)
                  pl.BlockSpec((gp, tm), lambda i, k: (0, i))],  # P columns of row tile
        out_specs=(pl.BlockSpec((tm, hp), lambda i, k: (i, 0)),
                   pl.BlockSpec((1, gp, hp), lambda i, k: (i, 0, 0))),
        scratch_shapes=[pltpu.VMEM((tm, hp), jnp.float32)],
        compiler_params=pltpu.CompilerParams(
            dimension_semantics=("parallel", "arbitrary"),
            vmem_limit_bytes=vmem_limit),
    )(a_hat, xw, b_pad, pool_mat)

    pool = pool_part.sum(axis=0)        # tiny [Gp, Hp] reduction (glue)
    return h_out, pool


# --------------------------- full forward ---------------------------

def gcn_forward(x, edge_index, batch, params, num_graphs):
    """x: [N, feat] f32, edge_index: [2, E] i32, batch: [N] i32."""
    n, feat = x.shape
    hidden = params["w1"].shape[1]

    tm = 256 if n <= 256 else 512
    n_pad = _round_up(n, tm)
    fp = _round_up(feat, LANE)
    hp = _round_up(hidden, LANE)
    gp = _round_up(num_graphs, 8)

    vmem_limit = _vmem_limit_bytes()
    tk, xw_resident = _plan_agg(n_pad, tm, hp, gp, vmem_limit)

    # ---- glue: normalized adjacency (bf16, zero-padded) and pooling matrix ----
    # TODO(synk): for large N build A_hat sparsely / blockwise instead of the dense f32
    # scatter intermediate.
    src, dst = edge_index[0], edge_index[1]
    adj = jnp.zeros((n_pad, n_pad), jnp.float32).at[dst, src].add(1.0)
    adj = adj.at[jnp.arange(n), jnp.arange(n)].add(1.0)          # self loops (real nodes)
    deg = jnp.sum(adj, axis=1)
    dinv = jnp.where(deg > 0, 1.0 / jnp.sqrt(deg), 0.0)
    a_hat = (adj * dinv[:, None] * dinv[None, :]).astype(jnp.bfloat16)

    batch_pad = jnp.full((n_pad,), -1, jnp.int32).at[:n].set(batch)
    pool_mat = (batch_pad[None, :] == jnp.arange(gp)[:, None]).astype(jnp.float32)

    x_pad = jnp.pad(x, ((0, n_pad - n), (0, fp - feat))).astype(jnp.bfloat16)

    def pad_w(w):
        wp = jnp.pad(w, ((0, _round_up(w.shape[0], LANE) - w.shape[0]),
                         (0, hp - w.shape[1])))
        return wp.astype(jnp.bfloat16)

    def pad_b(b):
        return jnp.pad(b, ((0, 0), (0, hp - b.shape[1])))

    h = x_pad
    pools = []
    for l in (1, 2, 3):
        h, pool = gcn_layer(a_hat, pool_mat, h,
                            pad_w(params[f"w{l}"]), pad_b(params[f"b{l}"]),
                            tm=tm, tk=tk, xw_resident=xw_resident,
                            vmem_limit=vmem_limit)
        pools.append(pool[:num_graphs, :hidden])

    global_rep = jnp.concatenate(pools, axis=1)                  # glue: layout only
    h_last = h[:n, :hidden].astype(jnp.float32)
    return global_rep, h_last


# --------------------------- reference & init ---------------------------

def gcn_reference(x, edge_index, batch, params, num_graphs):
    n = x.shape[0]
    src, dst = edge_index[0], edge_index[1]
    adj = jnp.zeros((n, n), jnp.float32).at[dst, src].add(1.0) + jnp.eye(n)
    deg = jnp.sum(adj, axis=1)
    dinv = jnp.where(deg > 0, 1.0 / jnp.sqrt(deg), 0.0)
    a = adj * dinv[:, None] * dinv[None, :]
    pmat = (batch[None, :] == jnp.arange(num_graphs)[:, None]).astype(jnp.float32)
    h = x
    pools = []
    for l in (1, 2, 3):
        h = jnp.maximum(a @ (h @ params[f"w{l}"]) + params[f"b{l}"], 0.0)
        pools.append(pmat @ h)
    return jnp.concatenate(pools, axis=1), h


def init_params(key, feat_dim, hidden_dim, n_layers=3):
    """Xavier-uniform weights, zero biases — matches weights_init."""
    params = {}
    keys = jax.random.split(key, n_layers)
    for i in range(n_layers):
        fin = feat_dim if i == 0 else hidden_dim
        bound = jnp.sqrt(6.0 / (fin + hidden_dim))
        w = jax.random.uniform(keys[i], (fin, hidden_dim), jnp.float32, -bound, bound)
        params[f"w{i + 1}"] = w
        params[f"b{i + 1}"] = jnp.zeros((1, hidden_dim), jnp.float32)
    return params


if __name__ == "__main__":
    key = jax.random.PRNGKey(0)
    k_x, k_p = jax.random.split(key)

    N = 8            # total nodes across the batch of graphs
    feat_dim = 4
    hidden_dim = 32
    num_graphs = 2

    x = jax.random.normal(k_x, (N, feat_dim), jnp.float32)
    # Two ring graphs of 4 nodes each (undirected -> both directions listed).
    src = jnp.array([0, 1, 1, 2, 2, 3, 3, 0, 4, 5, 5, 6, 6, 7, 7, 4], jnp.int32)
    dst = jnp.array([1, 0, 2, 1, 3, 2, 0, 3, 5, 4, 6, 5, 7, 6, 4, 7], jnp.int32)
    edge_index = jnp.stack([src, dst], axis=0)
    batch = jnp.array([0, 0, 0, 0, 1, 1, 1, 1], jnp.int32)

    params = init_params(k_p, feat_dim, hidden_dim, n_layers=3)

    global_rep, h_last = gcn_forward(x, edge_index, batch, params, num_graphs)
    jax.block_until_ready((global_rep, h_last))

    assert global_rep.shape == (num_graphs, 3 * hidden_dim)
    assert h_last.shape == (N, hidden_dim)

    # Validate against f32 pure-JAX reference (bf16 A / XW / h drift tolerated).
    ref_rep, ref_h = gcn_reference(x, edge_index, batch, params, num_graphs)
    np.testing.assert_allclose(np.asarray(global_rep), np.asarray(ref_rep),
                               rtol=5e-2, atol=5e-2)
    np.testing.assert_allclose(np.asarray(h_last), np.asarray(ref_h),
                               rtol=5e-2, atol=5e-2)

    print("KERNEL_OK")
</pallas_src>

<mosaic_0001>
module attributes {stable_mosaic.version = 11 : i64} {
  func.func @xw_kernel(%arg0: i32, %arg1: memref<256x128xbf16, #tpu.memory_space<vmem>>, %arg2: memref<128x128xbf16, #tpu.memory_space<vmem>>, %arg3: memref<256x128xbf16, #tpu.memory_space<vmem>>) attributes {dimension_semantics = [#tpu.dimension_semantics<parallel>], iteration_bounds = array<i64: 1>, scalar_prefetch = 0 : i64, scratch_operands = 0 : i64, tpu.core_type = #tpu.core_type<tc>, window_params = [{transform_indices = @transform_0, window_bounds = array<i64: 256, 128>}, {pipeline_mode = #tpu.pipeline_mode<synchronous>, transform_indices = @transform_1, window_bounds = array<i64: 128, 128>}, {transform_indices = @transform_2, window_bounds = array<i64: 256, 128>}]} {
    %c0 = arith.constant 0 : index
    %c0_0 = arith.constant 0 : index
    %0 = vector.load %arg1[%c0, %c0_0] : memref<256x128xbf16, #tpu.memory_space<vmem>>, vector<256x128xbf16>
    %c0_1 = arith.constant 0 : index
    %c0_2 = arith.constant 0 : index
    %1 = vector.load %arg2[%c0_1, %c0_2] : memref<128x128xbf16, #tpu.memory_space<vmem>>, vector<128x128xbf16>
    %cst = arith.constant dense<0.000000e+00> : vector<256x128xf32>
    %2 = tpu.matmul %0, %1, %cst {dimension_numbers = #tpu.dot_dimension_numbers<[1], [0], [0], [1], [0, 0, 1, 1], [], []>} : vector<256x128xbf16>, vector<128x128xbf16>, vector<256x128xf32> -> vector<256x128xf32>
    %3 = arith.truncf %2 : vector<256x128xf32> to vector<256x128xbf16>
    %c0_3 = arith.constant 0 : index
    %c0_4 = arith.constant 0 : index
    %4 = vector.load %arg3[%c0_3, %c0_4] : memref<256x128xbf16, #tpu.memory_space<vmem>>, vector<256x128xbf16>
    tpu.vector_store %arg3[%c0_3, %c0_4], %3 {strides = array<i32>} : memref<256x128xbf16, #tpu.memory_space<vmem>>, vector<256x128xbf16>,
    return
  }
  func.func @transform_0(%arg0: i32) -> (i32, i32) {
    %c0_i32 = arith.constant 0 : i32
    %c0_i32_0 = arith.constant 0 : i32
    return %arg0, %c0_i32 : i32, i32
  }
  func.func @transform_1(%arg0: i32) -> (i32, i32) {
    %c0_i32 = arith.constant 0 : i32
    %c0_i32_0 = arith.constant 0 : i32
    %c0_i32_1 = arith.constant 0 : i32
    return %c0_i32, %c0_i32_0 : i32, i32
  }
  func.func @transform_2(%arg0: i32) -> (i32, i32) {
    %c0_i32 = arith.constant 0 : i32
    %c0_i32_0 = arith.constant 0 : i32
    return %arg0, %c0_i32 : i32, i32
  }
}

</mosaic_0001>

<bundles_post_ra>
// kernel: tpu_custom_call.1
= control target key start
LH: loop header
LB: loop body
LE: loop exit
PB: predicated region body
PF: predicated region fallthrough
CT: control target
= control target key end

     0   :  { %7 = vsyncpa [#allocation3], 0  ;;  %s1009_s0 = inlined_call_operand.hbm [shape: bf16[256,128], index: 0, kind: input, shape index: {}]   ;;  %s1010_s1 = inlined_call_operand.hbm [shape: bf16[128,128], index: 1, kind: input, shape index: {}]   ;;  %s1011_s2 = inlined_call_operand.hbm [shape: bf16[256,128], index: 2, kind: output, shape index: {}]  }
   0x1   :  { %8 = vsyncpa [#allocation6], 0 }
   0x2   :  { %9 = vsyncpa [#allocation4], 0  ;;  %s944_s9 = smov [#allocation2]   ;;  %s872_s13 = scalar_lea.hbm %s1009_s0, 2048 }
   0x3   :  { %s15_s10 = sshll.u32 %s944_s9, 4  ;;  %p873_p0 = scmp.ne.s32.totalorder %s1009_s0, %s872_s13  ;;  %s16_s10 = int_to_ptr.vmem [resolvable:$true] %s15_s10 }
   0x4   :  { %p876_p1 = scmp.lt.u32.totalorder %s872_s13, %s1009_s0 }
   0x6   :  { %p878_p2 = pnand %p876_p1, %p873_p0 }
   0x8   :  { %881 = shalt.err (!%p878_p2)
}
   0x9   :  { %s882_s18 = scalar_lea.vmem %s16_s10, 2048  ;;  %p887_p4 = scmp.lt.s32.totalorder %s16_s10, %s16_s10 }
   0xa   :  { %p883_p3 = scmp.ne.s32.totalorder %s16_s10, %s882_s18  ;;  %p888_p5 = scmp.lt.s32.totalorder %s882_s18, %s882_s18 }
   0xc   :  { %p889_p6 = por %p888_p5, %p887_p4 }
   0xe   :  { %p890_p7 = pnand %p889_p6, %p883_p3 }
  0x10   :  { %893 = shalt.err (!%p890_p7)
}
  0x11   :  { %s945_s19 = smov 64   ;;  %s946_s20 = smov 4  }
  0x12   :  { %21 = dma.hbm_to_vmem [thread:$0]  %s1009_s0, 2048, %s16_s10, [#allocation3], %s945_s19, %s945_s19, %s946_s20  }
  0x13   :  { %s947_s23 = smov [#allocation5]   ;;  %s894_s27 = scalar_lea.hbm %s1010_s1, 1024 }
  0x14   :  { %s27_s24 = sshll.u32 %s947_s23, 4  ;;  %p895_p8 = scmp.ne.s32.totalorder %s1010_s1, %s894_s27  ;;  %s28_s24 = int_to_ptr.vmem [resolvable:$true] %s27_s24 }
  0x15   :  { %p898_p9 = scmp.lt.u32.totalorder %s894_s27, %s1010_s1 }
  0x17   :  { %p900_p10 = pnand %p898_p9, %p895_p8 }
  0x19   :  { %903 = shalt.err (!%p900_p10)
}
  0x1a   :  { %s904_s4 = scalar_lea.vmem %s28_s24, 1024  ;;  %p909_p12 = scmp.lt.s32.totalorder %s28_s24, %s28_s24 }
  0x1b   :  { %p905_p11 = scmp.ne.s32.totalorder %s28_s24, %s904_s4  ;;  %p910_p13 = scmp.lt.s32.totalorder %s904_s4, %s904_s4 }
  0x1d   :  { %p911_p0 = por %p910_p13, %p909_p12 }
  0x1f   :  { %p912_p1 = pnand %p911_p0, %p905_p11 }
  0x21   :  { %915 = shalt.err (!%p912_p1)
}
  0x22   :  { %33 = dma.hbm_to_vmem [thread:$0]  %s1010_s1, 1024, %s28_s24, [#allocation6], %s945_s19, %s945_s19, %s946_s20  }
  0x23   :  { %938 = dma.done.wait [#allocation3], 2048  }
  0x24   :  { %939 = vsyncadd [#allocation3], 4294965248 }
  0x25   :  { %940 = dma.done.wait [#allocation6], 1024  }
  0x26   :  { %941 = vsyncadd [#allocation6], 4294966272  ;;  %v848_v0 = vld [vmem:[#allocation5] sm:$0xff]   ;;  %v849_v1 = vld [vmem:[#allocation5 + $0x8] sm:$0xff]   ;;  %s948_s1 = smov [#allocation7]  }
  0x27   :  { %779 = vmatprep.subr.bf16.mxu0 %v848_v0  ;;  %827 = vmatprep.subr.bf16.mxu1 %v848_v0  ;;  %v850_v2 = vld [vmem:[#allocation5 + $0x10] sm:$0xff]   ;;  %v851_v3 = vld [vmem:[#allocation5 + $0x18] sm:$0xff]   ;;  %v856_v4 = vld [vmem:[#allocation2] sm:$0xff]   ;;  %s559_s6 = sshll.u32 %s948_s1, 4  ;;  %s560_s6 = int_to_ptr.vmem [resolvable:$true] %s559_s6 }
  0x28   :  { %780 = vmatpush3.bf16.msra.mxu0 %v848_v0  ;;  %835 = vmatpush3.bf16.msra.mxu1 %v848_v0  ;;  %v857_v5 = vld [vmem:[#allocation2 + $0x40] sm:$0xff]   ;;  %v853_v7 = vld [vmem:[#allocation5 + $0x28] sm:$0xff]   ;;  %v854_v8 = vld [vmem:[#allocation5 + $0x30] sm:$0xff]   ;;  %s916_s7 = scalar_lea.vmem %s560_s6, 2048  ;;  %p921_p3 = scmp.lt.s32.totalorder %s560_s6, %s560_s6 }
  0x29   :  { %781 = vmatprep.subr.bf16.mxu0 %v849_v1  ;;  %828 = vmatprep.subr.bf16.mxu1 %v849_v1  ;;  %v852_v6 = vld [vmem:[#allocation5 + $0x20] sm:$0xff]   ;;  %v855_v9 = vld [vmem:[#allocation5 + $0x38] sm:$0xff]   ;;  %v858_v10 = vld [vmem:[#allocation2 + $0x8] sm:$0xff]   ;;  %p917_p2 = scmp.ne.s32.totalorder %s560_s6, %s916_s7  ;;  %p922_p4 = scmp.lt.s32.totalorder %s916_s7, %s916_s7 }
  0x2a   :  { %795 = vmatprep.mubr.bf16.mxu0 %v856_v4  ;;  %811 = vmatprep.mubr.bf16.mxu1 %v857_v5  ;;  %v859_v11 = vld [vmem:[#allocation2 + $0x48] sm:$0xff]   ;;  %v860_v12 = vld [vmem:[#allocation2 + $0x10] sm:$0xff]   ;;  %v862_v14 = vld [vmem:[#allocation2 + $0x18] sm:$0xff]  }
  0x2b   :  { %v861_v13 = vld [vmem:[#allocation2 + $0x50] sm:$0xff]   ;;  %v863_v15 = vld [vmem:[#allocation2 + $0x58] sm:$0xff]   ;;  %v864_v16 = vld [vmem:[#allocation2 + $0x20] sm:$0xff]   ;;  %p923_p5 = por %p922_p4, %p921_p3 }
  0x2c   :  { %782 = vmatpush3.bf16.msra.mxu0 %v849_v1  ;;  %836 = vmatpush3.bf16.msra.mxu1 %v849_v1  ;;  %v865_v17 = vld [vmem:[#allocation2 + $0x60] sm:$0xff]   ;;  %v866_v18 = vld [vmem:[#allocation2 + $0x28] sm:$0xff]   ;;  %v868_v20 = vld [vmem:[#allocation2 + $0x30] sm:$0xff]  }
  0x2d   :  { %783 = vmatprep.subr.bf16.mxu0 %v850_v2  ;;  %829 = vmatprep.subr.bf16.mxu1 %v850_v2  ;;  %v867_v19 = vld [vmem:[#allocation2 + $0x68] sm:$0xff]   ;;  %v869_v21 = vld [vmem:[#allocation2 + $0x70] sm:$0xff]   ;;  %v870_v22 = vld [vmem:[#allocation2 + $0x38] sm:$0xff]   ;;  %p924_p6 = pnand %p923_p5, %p917_p2 }
  0x2e   :  { %v871_v23 = vld [vmem:[#allocation2 + $0x78] sm:$0xff]  }
  0x30   :  { %784 = vmatpush3.bf16.msra.mxu0 %v850_v2  ;;  %837 = vmatpush3.bf16.msra.mxu1 %v850_v2 }
  0x31   :  { %785 = vmatprep.subr.bf16.mxu0 %v851_v3  ;;  %830 = vmatprep.subr.bf16.mxu1 %v851_v3 }
  0x34   :  { %786 = vmatpush3.bf16.msra.mxu0 %v851_v3  ;;  %838 = vmatpush3.bf16.msra.mxu1 %v851_v3 }
  0x35   :  { %787 = vmatprep.subr.bf16.mxu0 %v852_v6  ;;  %831 = vmatprep.subr.bf16.mxu1 %v852_v6 }
  0x38   :  { %788 = vmatpush3.bf16.msra.mxu0 %v852_v6  ;;  %839 = vmatpush3.bf16.msra.mxu1 %v852_v6 }
  0x39   :  { %789 = vmatprep.subr.bf16.mxu0 %v853_v7  ;;  %832 = vmatprep.subr.bf16.mxu1 %v853_v7 }
  0x3c   :  { %790 = vmatpush3.bf16.msra.mxu0 %v853_v7  ;;  %840 = vmatpush3.bf16.msra.mxu1 %v853_v7 }
  0x3d   :  { %791 = vmatprep.subr.bf16.mxu0 %v854_v8  ;;  %833 = vmatprep.subr.bf16.mxu1 %v854_v8 }
  0x40   :  { %792 = vmatpush3.bf16.msra.mxu0 %v854_v8  ;;  %841 = vmatpush3.bf16.msra.mxu1 %v854_v8 }
  0x41   :  { %793 = vmatprep.subr.bf16.mxu0 %v855_v9  ;;  %834 = vmatprep.subr.bf16.mxu1 %v855_v9 }
  0x44   :  { %794 = vmatpush3.bf16.msra.mxu0 %v855_v9  ;;  %842 = vmatpush3.bf16.msra.mxu1 %v855_v9 }
  0x47   :  { %796 = vmatmul.mubr.bf16.vlgmr.msra.gmra.mrb[0].mxu0 %v858_v10  ;;  %812 = vmatmul.mubr.bf16.vlgmr.msra.gmra.mrb[0].mxu1 %v859_v11 }
  0x48   :  { %799 = vmatprep.mubr.bf16.mxu0 %v860_v12  ;;  %815 = vmatprep.mubr.bf16.mxu1 %v861_v13 }
  0x4f   :  { %800 = vmatmul.mubr.bf16.gmra.mrb[4].mxu0 %v862_v14  ;;  %816 = vmatmul.mubr.bf16.gmra.mrb[4].mxu1 %v863_v15 }
  0x50   :  { %803 = vmatprep.mubr.bf16.mxu0 %v864_v16  ;;  %819 = vmatprep.mubr.bf16.mxu1 %v865_v17 }
  0x57   :  { %804 = vmatmul.mubr.bf16.gmra.mrb[8].mxu0 %v866_v18  ;;  %820 = vmatmul.mubr.bf16.gmra.mrb[8].mxu1 %v867_v19 }
  0x58   :  { %807 = vmatprep.mubr.bf16.mxu0 %v868_v20  ;;  %823 = vmatprep.mubr.bf16.mxu1 %v869_v21 }
  0x5f   :  { %808 = vmatmul.mubr.bf16.gmra.mrb[12].mxu0 %v870_v22  ;;  %824 = vmatmul.mubr.bf16.gmra.mrb[12].mxu1 %v871_v23 }
 0x11a   :  { %v797_v24 = vpop.f32.mrb[0].mxu0  ;;  %v813_v25 = vpop.f32.mrb[0].mxu1 }
 0x11b   :  { %v267_v26 = vpop.f32.mrb[1].mxu0  ;;  %v331_v27 = vpop.f32.mrb[1].mxu1 }
 0x11c   :  { %v798_v28 = vpop.f32.mrb[2].mxu0  ;;  %v814_v29 = vpop.f32.mrb[2].mxu1 }
 0x11d   :  { %v668_v30 = vpack.c.bf16 %v798_v28, %v797_v24  ;;  %v708_v31 = vpack.c.bf16 %v814_v29, %v813_v25  ;;  %v270_v32 = vpop.f32.mrb[3].mxu0  ;;  %v334_v33 = vpop.f32.mrb[3].mxu1 }
 0x11e   :  { %v663_v34 = vpack.c.bf16 %v270_v32, %v267_v26  ;;  %v703_v35 = vpack.c.bf16 %v334_v33, %v331_v27 }
 0x11f   :  { %740 = vst [vmem:[#allocation7 + $0x8] sm:$0xff] %v668_v30   ;;  %748 = vst [vmem:[#allocation7 + $0x48] sm:$0xff] %v708_v31  }
 0x120   :  { %664 = vst [vmem:[#allocation7] sm:$0xff] %v663_v34   ;;  %747 = vst [vmem:[#allocation7 + $0x40] sm:$0xff] %v703_v35  }
 0x122   :  { %v801_v36 = vpop.f32.mrb[4].mxu0  ;;  %v817_v37 = vpop.f32.mrb[4].mxu1 }
 0x123   :  { %v283_v38 = vpop.f32.mrb[5].mxu0  ;;  %v347_v39 = vpop.f32.mrb[5].mxu1 }
 0x124   :  { %v802_v40 = vpop.f32.mrb[6].mxu0  ;;  %v818_v41 = vpop.f32.mrb[6].mxu1 }
 0x125   :  { %v678_v42 = vpack.c.bf16 %v802_v40, %v801_v36  ;;  %v718_v43 = vpack.c.bf16 %v818_v41, %v817_v37  ;;  %v286_v44 = vpop.f32.mrb[7].mxu0  ;;  %v350_v45 = vpop.f32.mrb[7].mxu1 }
 0x126   :  { %v673_v46 = vpack.c.bf16 %v286_v44, %v283_v38  ;;  %v713_v47 = vpack.c.bf16 %v350_v45, %v347_v39 }
 0x127   :  { %742 = vst [vmem:[#allocation7 + $0x18] sm:$0xff] %v678_v42   ;;  %750 = vst [vmem:[#allocation7 + $0x58] sm:$0xff] %v718_v43  }
 0x128   :  { %741 = vst [vmem:[#allocation7 + $0x10] sm:$0xff] %v673_v46   ;;  %749 = vst [vmem:[#allocation7 + $0x50] sm:$0xff] %v713_v47  }
 0x12a   :  { %v805_v48 = vpop.f32.mrb[8].mxu0  ;;  %v821_v49 = vpop.f32.mrb[8].mxu1 }
 0x12b   :  { %v299_v50 = vpop.f32.mrb[9].mxu0  ;;  %v363_v51 = vpop.f32.mrb[9].mxu1 }
 0x12c   :  { %v806_v52 = vpop.f32.mrb[10].mxu0  ;;  %v822_v53 = vpop.f32.mrb[10].mxu1 }
 0x12d   :  { %v688_v54 = vpack.c.bf16 %v806_v52, %v805_v48  ;;  %v728_v55 = vpack.c.bf16 %v822_v53, %v821_v49  ;;  %v302_v56 = vpop.f32.mrb[11].mxu0  ;;  %v366_v57 = vpop.f32.mrb[11].mxu1 }
 0x12e   :  { %v683_v58 = vpack.c.bf16 %v302_v56, %v299_v50  ;;  %v723_v59 = vpack.c.bf16 %v366_v57, %v363_v51 }
 0x12f   :  { %744 = vst [vmem:[#allocation7 + $0x28] sm:$0xff] %v688_v54   ;;  %752 = vst [vmem:[#allocation7 + $0x68] sm:$0xff] %v728_v55  }
 0x130   :  { %743 = vst [vmem:[#allocation7 + $0x20] sm:$0xff] %v683_v58   ;;  %751 = vst [vmem:[#allocation7 + $0x60] sm:$0xff] %v723_v59  }
 0x132   :  { %v809_v60 = vpop.f32.mrb[12].mxu0  ;;  %v825_v61 = vpop.f32.mrb[12].mxu1 }
 0x133   :  { %v315_v62 = vpop.f32.mrb[13].mxu0  ;;  %v379_v63 = vpop.f32.mrb[13].mxu1 }
 0x134   :  { %v810_v0 = vpop.f32.mrb[14].mxu0  ;;  %v826_v1 = vpop.f32.mrb[14].mxu1 }
 0x135   :  { %v698_v2 = vpack.c.bf16 %v810_v0, %v809_v60  ;;  %v738_v3 = vpack.c.bf16 %v826_v1, %v825_v61  ;;  %v318_v4 = vpop.f32.mrb[15].mxu0  ;;  %v382_v5 = vpop.f32.mrb[15].mxu1 }
 0x136   :  { %v693_v6 = vpack.c.bf16 %v318_v4, %v315_v62  ;;  %v733_v7 = vpack.c.bf16 %v382_v5, %v379_v63 }
 0x137   :  { %746 = vst [vmem:[#allocation7 + $0x38] sm:$0xff] %v698_v2   ;;  %754 = vst [vmem:[#allocation7 + $0x78] sm:$0xff] %v738_v3  }
 0x138   :  { %745 = vst [vmem:[#allocation7 + $0x30] sm:$0xff] %v693_v6   ;;  %753 = vst [vmem:[#allocation7 + $0x70] sm:$0xff] %v733_v7  }
 0x139   :  { %927 = shalt.err (!%p924_p6)
}
 0x13a   :  { %s928_s10 = scalar_lea.hbm %s1011_s2, 2048 }
 0x13b   :  { %p929_p7 = scmp.ne.s32.totalorder %s1011_s2, %s928_s10  ;;  %p932_p8 = scmp.lt.u32.totalorder %s928_s10, %s1011_s2 }
 0x13d   :  { %p934_p9 = pnand %p932_p8, %p929_p7 }
 0x13f   :  { %937 = shalt.err (!%p934_p9)
}
 0x140   :  { %565 = dma.vmem_to_hbm [thread:$0]  %s560_s6, 2048, %s1011_s2, [#allocation4], %s945_s19, %s945_s19, %s946_s20  }
 0x141   :  { %942 = dma.done.wait [#allocation4], 2048  }
 0x142   :  { %943 = vsyncadd [#allocation4], 4294965248 }
 0x143   :  { %569 = vsyncpa [#allocation3], 1 }
 0x144   :  { %570 = vsyncpa [#allocation6], 1 }
 0x145   :  { %571 = vsyncpa [#allocation4], 1 }

</bundles_post_ra>
